<compile_context>
chip_gen: v5e
topology: v5e:2x2
jax: 0.10.0
libtpu: 0.0.40
codegen_flags: <defaults>
</compile_context>

<pallas_src>
import jax
import jax.numpy as jnp
import numpy as np
from jax.experimental import pallas as pl
from jax.experimental.pallas import tpu as pltpu


def _entity_boundary_kernel(tokT_ref, ent_ref, bias_ref,
                            wt_ref, bt_ref, we_ref, be_ref, wb_ref,
                            out_ref, toklin_ref):
    """One (batch, T-tile, E-tile) grid step."""
    e_idx = pl.program_id(2)
    cdtype = toklin_ref.dtype

    # Token projection for this T-tile (shared by every entity tile) -> cached scratch.
    @pl.when(e_idx == 0)
    def _():
        tl = jnp.dot(wt_ref[...], tokT_ref[0],                      # (H,H)@(H,tT) on MXU
                     preferred_element_type=jnp.float32) + bt_ref[...]
        toklin_ref[...] = tl.astype(cdtype)

    # Entity projection for this E-tile, kept transposed as (H, tE).
    entT = ent_ref[0].T                                             # (H, tE)
    ent_linT = (jnp.dot(we_ref[...], entT,                          # (H,H)@(H,tE) on MXU
                        preferred_element_type=jnp.float32) + be_ref[...])
    ent_linT = ent_linT.astype(cdtype)

    tok_linT = toklin_ref[...]                                      # (H, tT)
    wb = wb_ref[...]                                                # (1, H)
    bias_row = bias_ref[0]                                          # (1, tT): +bb or -1e25

    tE = ent_ref.shape[1]
    # Static unroll over the (small) entity tile.  Each iteration:
    #   broadcast-add + tanh on the VPU/EUP, reduction over H on the MXU.
    for e in range(tE):
        col = ent_linT[:, e:e + 1]                                  # (H, 1)
        m_e = jnp.tanh(tok_linT + col)                              # (H, tT)
        row = jnp.dot(wb, m_e,                                      # (1,H)@(H,tT) -> (1,tT)
                      preferred_element_type=jnp.float32)
        prob = jax.nn.sigmoid(row + bias_row)                       # mask+bias folded in
        out_ref[0, pl.ds(e, 1), :] = prob.astype(out_ref.dtype)


def _pick_tile(dim, candidates):
    """Largest candidate that divides `dim`, else keep the full dimension as one block."""
    for c in candidates:
        if dim % c == 0:
            return c
    return dim


def entity_boundary_predictor(token_embedding, entity_embedding, token_mask, params,
                              *, compute_dtype=jnp.float32):
    """Forward pass of EntityBoundaryPredictor.

    params: dict with PyTorch-layout weights:
        wt (H,H) [out,in], bt (H,), we (H,H), be (H,), wb (1,H), bb (1,)
    compute_dtype: jnp.float32 (v5e / testing) or jnp.bfloat16 (v6e / v7x fast path;
        matmuls still accumulate in f32).
    """
    B, T, H = token_embedding.shape
    _, E, _ = entity_embedding.shape
    cd = compute_dtype

    tT = _pick_tile(T, (256, 128))   # lane-dense output tiles when T is 128-aligned
    tE = _pick_tile(E, (16, 8))      # falls back to full E if not 8-aligned

    # Tokens pre-transposed to (B, H, T): the kernel keeps tokens on the lane axis.
    tokT = jnp.swapaxes(token_embedding, 1, 2).astype(cd)           # (B, H, T)
    ent = entity_embedding.astype(cd)                               # (B, E, H)

    wt = params["wt"].astype(cd)                                    # (H, H) [out, in]
    we = params["we"].astype(cd)
    bt = params["bt"].reshape(H, 1).astype(jnp.float32)             # column biases
    be = params["be"].reshape(H, 1).astype(jnp.float32)
    wb = params["wb"].reshape(1, H).astype(cd)
    bb = params["bb"].reshape(()).astype(jnp.float32)

    # Fold boundary bias + token mask into one additive row bias:
    # +bb at valid tokens, -1e25 at masked tokens (sigmoid(-1e25) == 0, as in reference).
    bias = jnp.where(token_mask, bb, jnp.float32(-1e25)).astype(jnp.float32)
    bias = bias.reshape(B, 1, T)

    grid = (B, T // tT, E // tE)

    grid_spec = pltpu.PrefetchScalarGridSpec(
        num_scalar_prefetch=0,
        grid=grid,
        in_specs=[
            pl.BlockSpec((1, H, tT), lambda b, t, e: (b, 0, t)),    # tokens (transposed)
            pl.BlockSpec((1, tE, H), lambda b, t, e: (b, e, 0)),    # entities
            pl.BlockSpec((1, 1, tT), lambda b, t, e: (b, 0, t)),    # additive mask/bias
            pl.BlockSpec((H, H), lambda b, t, e: (0, 0)),           # W_token   (out, in)
            pl.BlockSpec((H, 1), lambda b, t, e: (0, 0)),           # b_token   (column)
            pl.BlockSpec((H, H), lambda b, t, e: (0, 0)),           # W_entity  (out, in)
            pl.BlockSpec((H, 1), lambda b, t, e: (0, 0)),           # b_entity  (column)
            pl.BlockSpec((1, H), lambda b, t, e: (0, 0)),           # w_boundary
        ],
        out_specs=pl.BlockSpec((1, tE, tT), lambda b, t, e: (b, e, t)),
        scratch_shapes=[pltpu.VMEM((H, tT), cd)],                   # cached token proj.
    )

    return pl.pallas_call(
        _entity_boundary_kernel,
        out_shape=jax.ShapeDtypeStruct((B, E, T), jnp.float32),
        grid_spec=grid_spec,
        compiler_params=pltpu.CompilerParams(
            dimension_semantics=("parallel", "parallel", "arbitrary"),
            vmem_limit_bytes=32 * 1024 * 1024),
    )(tokT, ent, bias, wt, bt, we, be, wb)


def _reference(token_embedding, entity_embedding, token_mask, params):
    tok_lin = token_embedding @ params["wt"].T + params["bt"]        # (B, T, H)
    ent_lin = entity_embedding @ params["we"].T + params["be"]       # (B, E, H)
    m = jnp.tanh(tok_lin[:, None, :, :] + ent_lin[:, :, None, :])    # (B, E, T, H)
    logits = jnp.einsum("beth,h->bet", m, params["wb"][0]) + params["bb"][0]
    logits = jnp.where(token_mask[:, None, :], logits, -1e25)
    return jax.nn.sigmoid(logits)


if __name__ == "__main__":
    B, T, E, H = 2, 16, 8, 32   # batch, tokens, entities, hidden_size

    key = jax.random.PRNGKey(0)
    ks = jax.random.split(key, 9)

    token_embedding = jax.random.normal(ks[0], (B, T, H), jnp.float32)
    entity_embedding = jax.random.normal(ks[1], (B, E, H), jnp.float32)
    token_mask = jax.random.uniform(ks[2], (B, T)) > 0.2             # bool (B, T)

    scale = 1.0 / np.sqrt(H)
    params = dict(   # PyTorch Linear layout: W is (out, in), b is (out,)
        wt=jax.random.uniform(ks[3], (H, H), jnp.float32, -scale, scale),
        bt=jax.random.uniform(ks[4], (H,), jnp.float32, -scale, scale),
        we=jax.random.uniform(ks[5], (H, H), jnp.float32, -scale, scale),
        be=jax.random.uniform(ks[6], (H,), jnp.float32, -scale, scale),
        wb=jax.random.uniform(ks[7], (1, H), jnp.float32, -scale, scale),
        bb=jax.random.uniform(ks[8], (1,), jnp.float32, -scale, scale),
    )

    out = entity_boundary_predictor(token_embedding, entity_embedding, token_mask, params)
    out = jax.block_until_ready(out)

    ref = _reference(token_embedding, entity_embedding, token_mask, params)
    np.testing.assert_allclose(np.asarray(out), np.asarray(ref), rtol=1e-5, atol=1e-5)

    print("KERNEL_OK")
</pallas_src>

<mosaic_0001>
module attributes {stable_mosaic.version = 11 : i64} {
  func.func @_entity_boundary_kernel(%arg0: i32, %arg1: i32, %arg2: i32, %arg3: memref<1x32x16xf32, #tpu.memory_space<vmem>>, %arg4: memref<1x8x32xf32, #tpu.memory_space<vmem>>, %arg5: memref<1x1x16xf32, #tpu.memory_space<vmem>>, %arg6: memref<32x32xf32, #tpu.memory_space<vmem>>, %arg7: memref<32x1xf32, #tpu.memory_space<vmem>>, %arg8: memref<32x32xf32, #tpu.memory_space<vmem>>, %arg9: memref<32x1xf32, #tpu.memory_space<vmem>>, %arg10: memref<1x32xf32, #tpu.memory_space<vmem>>, %arg11: memref<1x8x16xf32, #tpu.memory_space<vmem>>, %arg12: memref<32x16xf32, #tpu.memory_space<vmem>>) attributes {dimension_semantics = [#tpu.dimension_semantics<parallel>, #tpu.dimension_semantics<parallel>, #tpu.dimension_semantics<arbitrary>], iteration_bounds = array<i64: 2, 1, 1>, scalar_prefetch = 0 : i64, scratch_operands = 1 : i64, tpu.core_type = #tpu.core_type<tc>, window_params = [{transform_indices = @transform_0, window_bounds = array<i64: 1, 32, 16>}, {transform_indices = @transform_1, window_bounds = array<i64: 1, 8, 32>}, {transform_indices = @transform_2, window_bounds = array<i64: 1, 1, 16>}, {pipeline_mode = #tpu.pipeline_mode<synchronous>, transform_indices = @transform_3, window_bounds = array<i64: 32, 32>}, {pipeline_mode = #tpu.pipeline_mode<synchronous>, transform_indices = @transform_4, window_bounds = array<i64: 32, 1>}, {pipeline_mode = #tpu.pipeline_mode<synchronous>, transform_indices = @transform_5, window_bounds = array<i64: 32, 32>}, {pipeline_mode = #tpu.pipeline_mode<synchronous>, transform_indices = @transform_6, window_bounds = array<i64: 32, 1>}, {pipeline_mode = #tpu.pipeline_mode<synchronous>, transform_indices = @transform_7, window_bounds = array<i64: 1, 32>}, {transform_indices = @transform_8, window_bounds = array<i64: 1, 8, 16>}]} {
    %c0_i32 = arith.constant 0 : i32
    %0 = arith.cmpi eq, %arg2, %c0_i32 : i32
    %1 = arith.extui %0 : i1 to i32
    %c0_i32_0 = arith.constant 0 : i32
    %2 = arith.cmpi ne, %1, %c0_i32_0 : i32
    scf.if %2 {
      %c0_47 = arith.constant 0 : index
      %c0_48 = arith.constant 0 : index
      %127 = vector.load %arg6[%c0_47, %c0_48] : memref<32x32xf32, #tpu.memory_space<vmem>>, vector<32x32xf32>
      %c0_49 = arith.constant 0 : index
      %c0_50 = arith.constant 0 : index
      %c0_51 = arith.constant 0 : index
      %128 = vector.load %arg3[%c0_49, %c0_50, %c0_51] : memref<1x32x16xf32, #tpu.memory_space<vmem>>, vector<1x32x16xf32>
      %129 = vector.shape_cast %128 : vector<1x32x16xf32> to vector<32x16xf32>
      %cst_52 = arith.constant dense<0.000000e+00> : vector<32x16xf32>
      %130 = tpu.matmul %127, %129, %cst_52 {dimension_numbers = #tpu.dot_dimension_numbers<[1], [0], [0], [1], [0, 0, 1, 1], [], []>} : vector<32x32xf32>, vector<32x16xf32>, vector<32x16xf32> -> vector<32x16xf32>
      %c0_53 = arith.constant 0 : index
      %c0_54 = arith.constant 0 : index
      %131 = vector.load %arg7[%c0_53, %c0_54] : memref<32x1xf32, #tpu.memory_space<vmem>>, vector<32x1xf32>
      %132 = vector.broadcast %131 : vector<32x1xf32> to vector<32x16xf32>
      %133 = arith.addf %130, %132 : vector<32x16xf32>
      %c0_55 = arith.constant 0 : index
      %c0_56 = arith.constant 0 : index
      %134 = vector.load %arg12[%c0_55, %c0_56] : memref<32x16xf32, #tpu.memory_space<vmem>>, vector<32x16xf32>
      tpu.vector_store %arg12[%c0_55, %c0_56], %133 {strides = array<i32>} : memref<32x16xf32, #tpu.memory_space<vmem>>, vector<32x16xf32>,
    } else {
    }
    %c0 = arith.constant 0 : index
    %c0_1 = arith.constant 0 : index
    %c0_2 = arith.constant 0 : index
    %3 = vector.load %arg4[%c0, %c0_1, %c0_2] : memref<1x8x32xf32, #tpu.memory_space<vmem>>, vector<1x8x32xf32>
    %4 = vector.shape_cast %3 : vector<1x8x32xf32> to vector<8x32xf32>
    %5 = tpu.transpose %4, [1, 0] : vector<8x32xf32> -> vector<32x8xf32>
    %c0_3 = arith.constant 0 : index
    %c0_4 = arith.constant 0 : index
    %6 = vector.load %arg8[%c0_3, %c0_4] : memref<32x32xf32, #tpu.memory_space<vmem>>, vector<32x32xf32>
    %cst = arith.constant dense<0.000000e+00> : vector<32x8xf32>
    %7 = tpu.matmul %6, %5, %cst {dimension_numbers = #tpu.dot_dimension_numbers<[1], [0], [0], [1], [0, 0, 1, 1], [], []>} : vector<32x32xf32>, vector<32x8xf32>, vector<32x8xf32> -> vector<32x8xf32>
    %c0_5 = arith.constant 0 : index
    %c0_6 = arith.constant 0 : index
    %8 = vector.load %arg9[%c0_5, %c0_6] : memref<32x1xf32, #tpu.memory_space<vmem>>, vector<32x1xf32>
    %9 = vector.broadcast %8 : vector<32x1xf32> to vector<32x8xf32>
    %10 = arith.addf %7, %9 : vector<32x8xf32>
    %c0_7 = arith.constant 0 : index
    %c0_8 = arith.constant 0 : index
    %11 = vector.load %arg12[%c0_7, %c0_8] : memref<32x16xf32, #tpu.memory_space<vmem>>, vector<32x16xf32>
    %c0_9 = arith.constant 0 : index
    %c0_10 = arith.constant 0 : index
    %12 = vector.load %arg10[%c0_9, %c0_10] : memref<1x32xf32, #tpu.memory_space<vmem>>, vector<1x32xf32>
    %c0_11 = arith.constant 0 : index
    %c0_12 = arith.constant 0 : index
    %c0_13 = arith.constant 0 : index
    %13 = vector.load %arg5[%c0_11, %c0_12, %c0_13] : memref<1x1x16xf32, #tpu.memory_space<vmem>>, vector<1x1x16xf32>
    %14 = vector.shape_cast %13 : vector<1x1x16xf32> to vector<1x16xf32>
    %15 = vector.extract_strided_slice %10 {offsets = [0, 0], sizes = [32, 1], strides = [1, 1]} : vector<32x8xf32> to vector<32x1xf32>
    %16 = vector.broadcast %15 : vector<32x1xf32> to vector<32x16xf32>
    %17 = arith.addf %11, %16 : vector<32x16xf32>
    %18 = math.tanh %17 : vector<32x16xf32>
    %cst_14 = arith.constant dense<0.000000e+00> : vector<1x16xf32>
    %19 = tpu.matmul %12, %18, %cst_14 {dimension_numbers = #tpu.dot_dimension_numbers<[1], [0], [0], [1], [0, 0, 1, 1], [], []>} : vector<1x32xf32>, vector<32x16xf32>, vector<1x16xf32> -> vector<1x16xf32>
    %20 = arith.addf %19, %14 : vector<1x16xf32>
    %21 = arith.negf %20 : vector<1x16xf32>
    %22 = math.exp %21 : vector<1x16xf32>
    %cst_15 = arith.constant 1.000000e+00 : f32
    %23 = vector.broadcast %cst_15 : f32 to vector<1x16xf32>
    %24 = arith.addf %23, %22 : vector<1x16xf32>
    %25 = arith.divf %23, %24 : vector<1x16xf32>
    %c0_16 = arith.constant 0 : index
    %c0_17 = arith.constant 0 : index
    %c0_18 = arith.constant 0 : index
    %26 = vector.load %arg11[%c0_16, %c0_17, %c0_18] : memref<1x8x16xf32, #tpu.memory_space<vmem>>, vector<1x1x16xf32>
    %27 = vector.shape_cast %26 : vector<1x1x16xf32> to vector<1x16xf32>
    %28 = vector.shape_cast %25 : vector<1x16xf32> to vector<1x1x16xf32>
    tpu.vector_store %arg11[%c0_16, %c0_17, %c0_18], %28 {strides = array<i32>} : memref<1x8x16xf32, #tpu.memory_space<vmem>>, vector<1x1x16xf32>,
    %29 = vector.extract_strided_slice %10 {offsets = [0, 1], sizes = [32, 1], strides = [1, 1]} : vector<32x8xf32> to vector<32x1xf32>
    %30 = vector.broadcast %29 : vector<32x1xf32> to vector<32x16xf32>
    %31 = arith.addf %11, %30 : vector<32x16xf32>
    %32 = math.tanh %31 : vector<32x16xf32>
    %cst_19 = arith.constant dense<0.000000e+00> : vector<1x16xf32>
    %33 = tpu.matmul %12, %32, %cst_19 {dimension_numbers = #tpu.dot_dimension_numbers<[1], [0], [0], [1], [0, 0, 1, 1], [], []>} : vector<1x32xf32>, vector<32x16xf32>, vector<1x16xf32> -> vector<1x16xf32>
    %34 = arith.addf %33, %14 : vector<1x16xf32>
    %35 = arith.negf %34 : vector<1x16xf32>
    %36 = math.exp %35 : vector<1x16xf32>
    %cst_20 = arith.constant 1.000000e+00 : f32
    %37 = vector.broadcast %cst_20 : f32 to vector<1x16xf32>
    %38 = arith.addf %37, %36 : vector<1x16xf32>
    %39 = arith.divf %37, %38 : vector<1x16xf32>
    %c0_21 = arith.constant 0 : index
    %c1 = arith.constant 1 : index
    %c0_22 = arith.constant 0 : index
    %40 = vector.load %arg11[%c0_21, %c1, %c0_22] : memref<1x8x16xf32, #tpu.memory_space<vmem>>, vector<1x1x16xf32>
    %41 = vector.shape_cast %40 : vector<1x1x16xf32> to vector<1x16xf32>
    %42 = vector.shape_cast %39 : vector<1x16xf32> to vector<1x1x16xf32>
    tpu.vector_store %arg11[%c0_21, %c1, %c0_22], %42 {strides = array<i32>} : memref<1x8x16xf32, #tpu.memory_space<vmem>>, vector<1x1x16xf32>,
    %43 = vector.extract_strided_slice %10 {offsets = [0, 2], sizes = [32, 1], strides = [1, 1]} : vector<32x8xf32> to vector<32x1xf32>
    %44 = vector.broadcast %43 : vector<32x1xf32> to vector<32x16xf32>
    %45 = arith.addf %11, %44 : vector<32x16xf32>
    %46 = math.tanh %45 : vector<32x16xf32>
    %cst_23 = arith.constant dense<0.000000e+00> : vector<1x16xf32>
    %47 = tpu.matmul %12, %46, %cst_23 {dimension_numbers = #tpu.dot_dimension_numbers<[1], [0], [0], [1], [0, 0, 1, 1], [], []>} : vector<1x32xf32>, vector<32x16xf32>, vector<1x16xf32> -> vector<1x16xf32>
    %48 = arith.addf %47, %14 : vector<1x16xf32>
    %49 = arith.negf %48 : vector<1x16xf32>
    %50 = math.exp %49 : vector<1x16xf32>
    %cst_24 = arith.constant 1.000000e+00 : f32
    %51 = vector.broadcast %cst_24 : f32 to vector<1x16xf32>
    %52 = arith.addf %51, %50 : vector<1x16xf32>
    %53 = arith.divf %51, %52 : vector<1x16xf32>
    %c0_25 = arith.constant 0 : index
    %c2 = arith.constant 2 : index
    %c0_26 = arith.constant 0 : index
    %54 = vector.load %arg11[%c0_25, %c2, %c0_26] : memref<1x8x16xf32, #tpu.memory_space<vmem>>, vector<1x1x16xf32>
    %55 = vector.shape_cast %54 : vector<1x1x16xf32> to vector<1x16xf32>
    %56 = vector.shape_cast %53 : vector<1x16xf32> to vector<1x1x16xf32>
    tpu.vector_store %arg11[%c0_25, %c2, %c0_26], %56 {strides = array<i32>} : memref<1x8x16xf32, #tpu.memory_space<vmem>>, vector<1x1x16xf32>,
    %57 = vector.extract_strided_slice %10 {offsets = [0, 3], sizes = [32, 1], strides = [1, 1]} : vector<32x8xf32> to vector<32x1xf32>
    %58 = vector.broadcast %57 : vector<32x1xf32> to vector<32x16xf32>
    %59 = arith.addf %11, %58 : vector<32x16xf32>
    %60 = math.tanh %59 : vector<32x16xf32>
    %cst_27 = arith.constant dense<0.000000e+00> : vector<1x16xf32>
    %61 = tpu.matmul %12, %60, %cst_27 {dimension_numbers = #tpu.dot_dimension_numbers<[1], [0], [0], [1], [0, 0, 1, 1], [], []>} : vector<1x32xf32>, vector<32x16xf32>, vector<1x16xf32> -> vector<1x16xf32>
    %62 = arith.addf %61, %14 : vector<1x16xf32>
    %63 = arith.negf %62 : vector<1x16xf32>
    %64 = math.exp %63 : vector<1x16xf32>
    %cst_28 = arith.constant 1.000000e+00 : f32
    %65 = vector.broadcast %cst_28 : f32 to vector<1x16xf32>
    %66 = arith.addf %65, %64 : vector<1x16xf32>
    %67 = arith.divf %65, %66 : vector<1x16xf32>
    %c0_29 = arith.constant 0 : index
    %c3 = arith.constant 3 : index
    %c0_30 = arith.constant 0 : index
    %68 = vector.load %arg11[%c0_29, %c3, %c0_30] : memref<1x8x16xf32, #tpu.memory_space<vmem>>, vector<1x1x16xf32>
    %69 = vector.shape_cast %68 : vector<1x1x16xf32> to vector<1x16xf32>
    %70 = vector.shape_cast %67 : vector<1x16xf32> to vector<1x1x16xf32>
    tpu.vector_store %arg11[%c0_29, %c3, %c0_30], %70 {strides = array<i32>} : memref<1x8x16xf32, #tpu.memory_space<vmem>>, vector<1x1x16xf32>,
    %71 = vector.extract_strided_slice %10 {offsets = [0, 4], sizes = [32, 1], strides = [1, 1]} : vector<32x8xf32> to vector<32x1xf32>
    %72 = vector.broadcast %71 : vector<32x1xf32> to vector<32x16xf32>
    %73 = arith.addf %11, %72 : vector<32x16xf32>
    %74 = math.tanh %73 : vector<32x16xf32>
    %cst_31 = arith.constant dense<0.000000e+00> : vector<1x16xf32>
    %75 = tpu.matmul %12, %74, %cst_31 {dimension_numbers = #tpu.dot_dimension_numbers<[1], [0], [0], [1], [0, 0, 1, 1], [], []>} : vector<1x32xf32>, vector<32x16xf32>, vector<1x16xf32> -> vector<1x16xf32>
    %76 = arith.addf %75, %14 : vector<1x16xf32>
    %77 = arith.negf %76 : vector<1x16xf32>
    %78 = math.exp %77 : vector<1x16xf32>
    %cst_32 = arith.constant 1.000000e+00 : f32
    %79 = vector.broadcast %cst_32 : f32 to vector<1x16xf32>
    %80 = arith.addf %79, %78 : vector<1x16xf32>
    %81 = arith.divf %79, %80 : vector<1x16xf32>
    %c0_33 = arith.constant 0 : index
    %c4 = arith.constant 4 : index
    %c0_34 = arith.constant 0 : index
    %82 = vector.load %arg11[%c0_33, %c4, %c0_34] : memref<1x8x16xf32, #tpu.memory_space<vmem>>, vector<1x1x16xf32>
    %83 = vector.shape_cast %82 : vector<1x1x16xf32> to vector<1x16xf32>
    %84 = vector.shape_cast %81 : vector<1x16xf32> to vector<1x1x16xf32>
    tpu.vector_store %arg11[%c0_33, %c4, %c0_34], %84 {strides = array<i32>} : memref<1x8x16xf32, #tpu.memory_space<vmem>>, vector<1x1x16xf32>,
    %85 = vector.extract_strided_slice %10 {offsets = [0, 5], sizes = [32, 1], strides = [1, 1]} : vector<32x8xf32> to vector<32x1xf32>
    %86 = vector.broadcast %85 : vector<32x1xf32> to vector<32x16xf32>
    %87 = arith.addf %11, %86 : vector<32x16xf32>
    %88 = math.tanh %87 : vector<32x16xf32>
    %cst_35 = arith.constant dense<0.000000e+00> : vector<1x16xf32>
    %89 = tpu.matmul %12, %88, %cst_35 {dimension_numbers = #tpu.dot_dimension_numbers<[1], [0], [0], [1], [0, 0, 1, 1], [], []>} : vector<1x32xf32>, vector<32x16xf32>, vector<1x16xf32> -> vector<1x16xf32>
    %90 = arith.addf %89, %14 : vector<1x16xf32>
    %91 = arith.negf %90 : vector<1x16xf32>
    %92 = math.exp %91 : vector<1x16xf32>
    %cst_36 = arith.constant 1.000000e+00 : f32
    %93 = vector.broadcast %cst_36 : f32 to vector<1x16xf32>
    %94 = arith.addf %93, %92 : vector<1x16xf32>
    %95 = arith.divf %93, %94 : vector<1x16xf32>
    %c0_37 = arith.constant 0 : index
    %c5 = arith.constant 5 : index
    %c0_38 = arith.constant 0 : index
    %96 = vector.load %arg11[%c0_37, %c5, %c0_38] : memref<1x8x16xf32, #tpu.memory_space<vmem>>, vector<1x1x16xf32>
    %97 = vector.shape_cast %96 : vector<1x1x16xf32> to vector<1x16xf32>
    %98 = vector.shape_cast %95 : vector<1x16xf32> to vector<1x1x16xf32>
    tpu.vector_store %arg11[%c0_37, %c5, %c0_38], %98 {strides = array<i32>} : memref<1x8x16xf32, #tpu.memory_space<vmem>>, vector<1x1x16xf32>,
    %99 = vector.extract_strided_slice %10 {offsets = [0, 6], sizes = [32, 1], strides = [1, 1]} : vector<32x8xf32> to vector<32x1xf32>
    %100 = vector.broadcast %99 : vector<32x1xf32> to vector<32x16xf32>
    %101 = arith.addf %11, %100 : vector<32x16xf32>
    %102 = math.tanh %101 : vector<32x16xf32>
    %cst_39 = arith.constant dense<0.000000e+00> : vector<1x16xf32>
    %103 = tpu.matmul %12, %102, %cst_39 {dimension_numbers = #tpu.dot_dimension_numbers<[1], [0], [0], [1], [0, 0, 1, 1], [], []>} : vector<1x32xf32>, vector<32x16xf32>, vector<1x16xf32> -> vector<1x16xf32>
    %104 = arith.addf %103, %14 : vector<1x16xf32>
    %105 = arith.negf %104 : vector<1x16xf32>
    %106 = math.exp %105 : vector<1x16xf32>
    %cst_40 = arith.constant 1.000000e+00 : f32
    %107 = vector.broadcast %cst_40 : f32 to vector<1x16xf32>
    %108 = arith.addf %107, %106 : vector<1x16xf32>
    %109 = arith.divf %107, %108 : vector<1x16xf32>
    %c0_41 = arith.constant 0 : index
    %c6 = arith.constant 6 : index
    %c0_42 = arith.constant 0 : index
    %110 = vector.load %arg11[%c0_41, %c6, %c0_42] : memref<1x8x16xf32, #tpu.memory_space<vmem>>, vector<1x1x16xf32>
    %111 = vector.shape_cast %110 : vector<1x1x16xf32> to vector<1x16xf32>
    %112 = vector.shape_cast %109 : vector<1x16xf32> to vector<1x1x16xf32>
    tpu.vector_store %arg11[%c0_41, %c6, %c0_42], %112 {strides = array<i32>} : memref<1x8x16xf32, #tpu.memory_space<vmem>>, vector<1x1x16xf32>,
    %113 = vector.extract_strided_slice %10 {offsets = [0, 7], sizes = [32, 1], strides = [1, 1]} : vector<32x8xf32> to vector<32x1xf32>
    %114 = vector.broadcast %113 : vector<32x1xf32> to vector<32x16xf32>
    %115 = arith.addf %11, %114 : vector<32x16xf32>
    %116 = math.tanh %115 : vector<32x16xf32>
    %cst_43 = arith.constant dense<0.000000e+00> : vector<1x16xf32>
    %117 = tpu.matmul %12, %116, %cst_43 {dimension_numbers = #tpu.dot_dimension_numbers<[1], [0], [0], [1], [0, 0, 1, 1], [], []>} : vector<1x32xf32>, vector<32x16xf32>, vector<1x16xf32> -> vector<1x16xf32>
    %118 = arith.addf %117, %14 : vector<1x16xf32>
    %119 = arith.negf %118 : vector<1x16xf32>
    %120 = math.exp %119 : vector<1x16xf32>
    %cst_44 = arith.constant 1.000000e+00 : f32
    %121 = vector.broadcast %cst_44 : f32 to vector<1x16xf32>
    %122 = arith.addf %121, %120 : vector<1x16xf32>
    %123 = arith.divf %121, %122 : vector<1x16xf32>
    %c0_45 = arith.constant 0 : index
    %c7 = arith.constant 7 : index
    %c0_46 = arith.constant 0 : index
    %124 = vector.load %arg11[%c0_45, %c7, %c0_46] : memref<1x8x16xf32, #tpu.memory_space<vmem>>, vector<1x1x16xf32>
    %125 = vector.shape_cast %124 : vector<1x1x16xf32> to vector<1x16xf32>
    %126 = vector.shape_cast %123 : vector<1x16xf32> to vector<1x1x16xf32>
    tpu.vector_store %arg11[%c0_45, %c7, %c0_46], %126 {strides = array<i32>} : memref<1x8x16xf32, #tpu.memory_space<vmem>>, vector<1x1x16xf32>,
    return
  }
  func.func @transform_0(%arg0: i32, %arg1: i32, %arg2: i32) -> (i32, i32, i32) {
    %c0_i32 = arith.constant 0 : i32
    %c0_i32_0 = arith.constant 0 : i32
    return %arg0, %c0_i32, %arg1 : i32, i32, i32
  }
  func.func @transform_1(%arg0: i32, %arg1: i32, %arg2: i32) -> (i32, i32, i32) {
    %c0_i32 = arith.constant 0 : i32
    %c0_i32_0 = arith.constant 0 : i32
    return %arg0, %arg2, %c0_i32 : i32, i32, i32
  }
  func.func @transform_2(%arg0: i32, %arg1: i32, %arg2: i32) -> (i32, i32, i32) {
    %c0_i32 = arith.constant 0 : i32
    %c0_i32_0 = arith.constant 0 : i32
    return %arg0, %c0_i32, %arg1 : i32, i32, i32
  }
  func.func @transform_3(%arg0: i32, %arg1: i32, %arg2: i32) -> (i32, i32) {
    %c0_i32 = arith.constant 0 : i32
    %c0_i32_0 = arith.constant 0 : i32
    %c0_i32_1 = arith.constant 0 : i32
    return %c0_i32, %c0_i32_0 : i32, i32
  }
  func.func @transform_4(%arg0: i32, %arg1: i32, %arg2: i32) -> (i32, i32) {
    %c0_i32 = arith.constant 0 : i32
    %c0_i32_0 = arith.constant 0 : i32
    %c0_i32_1 = arith.constant 0 : i32
    return %c0_i32, %c0_i32_0 : i32, i32
  }
  func.func @transform_5(%arg0: i32, %arg1: i32, %arg2: i32) -> (i32, i32) {
    %c0_i32 = arith.constant 0 : i32
    %c0_i32_0 = arith.constant 0 : i32
    %c0_i32_1 = arith.constant 0 : i32
    return %c0_i32, %c0_i32_0 : i32, i32
  }
  func.func @transform_6(%arg0: i32, %arg1: i32, %arg2: i32) -> (i32, i32) {
    %c0_i32 = arith.constant 0 : i32
    %c0_i32_0 = arith.constant 0 : i32
    %c0_i32_1 = arith.constant 0 : i32
    return %c0_i32, %c0_i32_0 : i32, i32
  }
  func.func @transform_7(%arg0: i32, %arg1: i32, %arg2: i32) -> (i32, i32) {
    %c0_i32 = arith.constant 0 : i32
    %c0_i32_0 = arith.constant 0 : i32
    %c0_i32_1 = arith.constant 0 : i32
    return %c0_i32, %c0_i32_0 : i32, i32
  }
  func.func @transform_8(%arg0: i32, %arg1: i32, %arg2: i32) -> (i32, i32, i32) {
    %c0_i32 = arith.constant 0 : i32
    return %arg0, %arg2, %arg1 : i32, i32, i32
  }
}

</mosaic_0001>

<bundles_post_ra>
// kernel: tpu_custom_call.1
= control target key start
LH: loop header
LB: loop body
LE: loop exit
PB: predicated region body
PF: predicated region fallthrough
CT: control target
= control target key end

     0   :  { %13 = vsyncpa [#allocation4], 0  ;;  %s1883_s0 = inlined_call_operand.vmem [shape: f32[2,32,16], index: 0, kind: input, shape index: {}]   ;;  %s1884_s1 = inlined_call_operand.vmem [shape: f32[2,8,32], index: 1, kind: input, shape index: {}]   ;;  %s1885_s2 = inlined_call_operand.vmem [shape: f32[2,1,16], index: 2, kind: input, shape index: {}]   ;;  %s1886_s3 = inlined_call_operand.vmem [shape: f32[32,32], index: 3, kind: input, shape index: {}]   ;;  %s1887_s4 = inlined_call_operand.vmem [shape: f32[32,1], index: 4, kind: input, shape index: {}]   ;;  %s1888_s5 = inlined_call_operand.vmem [shape: f32[32,32], index: 5, kind: input, shape index: {}]   ;;  %s1889_s6 = inlined_call_operand.vmem [shape: f32[32,1], index: 6, kind: input, shape index: {}]   ;;  %s1890_s7 = inlined_call_operand.vmem [shape: f32[1,32], index: 7, kind: input, shape index: {}]   ;;  %s1891_s8 = inlined_call_operand.hbm [shape: f32[2,8,16], index: 8, kind: output, shape index: {}]  }
   0x1   :  { %15 = vsyncpa [#allocation4 + $0x1], 0  ;;  %s1562_s27 = smov 0   ;;  %s1564_s28 = smov 0  }
   0x2   :  { %s1566_s29 = smov 0   ;;  %s1568_s30 = smov 0  }
   0x3   :  { %s1570_s9 = smov 0   ;;  %s1572_s10 = smov 0  }
   0x4 LB: > { %s1197_s11 = sadd.s32 4294967295, %s1507_s10   ;;  %s1198_s12 = sadd.s32 4294967294, %s1507_s10   ;;  %s1507_s10 = sphi %s1572_s10, %s21_s10   ;;  %s1503_s9 = sphi %s1570_s9, %s1901_s9   ;;  %s1499_s30 = sphi %s1568_s30, %s1900_s30   ;;  %s1495_s29 = sphi %s1566_s29, %s1899_s29   ;;  %s1491_s28 = sphi %s1564_s28, %s1898_s28   ;;  %s1487_s27 = sphi %s1562_s27, %s1897_s27  }
   0x5   : > { %s40_s13 = sadd.s32 1, %s1503_s9  ;;  %s240_s14 = sadd.s32 1, %s1495_s29 }
   0x6   : > { %p42_p0 = scmp.ge.s32.totalorder %s40_s13, 2  ;;  %p250_p1 = scmp.ne.s32.totalorder %s1495_s29, %s1491_s28 }
   0x7   : > { %p251_p2 = scmp.eq.s32.totalorder %s1197_s11, 1  ;;  %p256_p3 = scmp.ne.s32.totalorder %s1491_s28, %s1487_s27 }
   0x8   : > { %s1903_s13 = smov (%p42_p0, %s40_s13), 0  ;;  %p257_p5 = scmp.eq.s32.totalorder %s1198_s12, 1 }
   0x9   : > { %1893 = sst [smem:[#allocation6_spill]] %s1903_s13  ;;  %p1602_p4 = por %p251_p2, %p250_p1 }
   0xa   : > { %s233_s16 = ssub.s32 %s1503_s9, %s1903_s13  ;;  %p1201_p6 = scmp.ge.s32.totalorder %s1507_s10, 1 }
   0xb   : > { %p238_p7 = scmp.eq.s32.totalorder %s233_s16, 0  ;;  %p1609_p8 = por %p257_p5, %p256_p3 }
   0xc   : > { %p320_p9 = scmp.lt.s32.totalorder %s1507_s10, 3 }
   0xd   : > { %s1615_s18 = scalar_select %p238_p7, %s1495_s29, %s240_s14  }
   0xe   : > { %p321_p10 = pnand %p1201_p6, %p320_p9 }
   0xf   : > { %p370_p11 = scmp.lt.s32.totalorder (!%p321_p10), %s1499_s30, 1  ;;  %s367_s14 = sand.u32 (!%p321_p10), 1, %s1491_s28  }
  0x10   : > { %324 = sbr.rel (%p321_p10) target bundleno = 551 (0x227), region = 52 }
  0x15   : > { %v480_v0 = vld [vmem:[%s1889_s6 + $0x8] sm:$0xff]  ;;  %v1509_v1 = vmov 0   ;;  %s1624_s21 = scalar_select %p370_p11, %s1499_s30, 1  ;;  %v482_v2 = vld [vmem:[%s1889_s6 + $0x18] sm:$0xff]  ;;  %vm427_vm0 = vcmask 261120   ;;  %v479_v6 = vld [vmem:[%s1889_s6] sm:$0xff] }
  0x16   : > { %1300 = vset.pattern.permute.xlu1 %v1509_v1  ;;  %1299 = vset.pattern.permute.xlu0 %v1509_v1  ;;  %v475_v7 = vld [vmem:[%s1888_s5] sm:$0xff]  ;;  %v481_v9 = vld [vmem:[%s1889_s6 + $0x10] sm:$0xff]  ;;  %v476_v13 = vld [vmem:[%s1888_s5 + $0x8] sm:$0xff]  ;;  %v1510_v22 = vmov 3   ;;  %v1511_v23 = vmov 1   ;;  %vm469_vm1 = vcmask 130048  }
  0x17   : > { %490 = vperm.xlu1 %1300, %v480_v0   ;;  %1301 = vset.pattern.permute.xlu2 %v1509_v1  ;;  %s1235_s24 = sshll.u32 %s1624_s21, 5  ;;  %s1205_s12 = sshll.u32 %s1624_s21, 3  ;;  %v395_v11 = vld [vmem:[%s1886_s3] sm:$0xff]  ;;  %v404_v14 = vld [vmem:[%s1887_s4 + $0x8] sm:$0xff]  ;;  %v477_v16 = vld [vmem:[%s1888_s5 + $0x10] sm:$0xff]  ;;  %v1512_v36 = vmov 5  }
  0x18   : > { %500 = vperm.xlu0 %1299, %v482_v2   ;;  %s377_s11 = scalar_lea.vmem %s1883_s0, %s1235_s24  ;;  %s384_s19 = scalar_lea.vmem %s1884_s1, %s1205_s12  ;;  %v403_v12 = vld [vmem:[%s1887_s4] sm:$0xff]  ;;  %v396_v15 = vld [vmem:[%s1886_s3 + $0x8] sm:$0xff]  ;;  %v397_v17 = vld [vmem:[%s1886_s3 + $0x10] sm:$0xff]  ;;  %v1513_v37 = vmov 2   ;;  %v1514_v42 = vmov 4   ;;  %v1515_v43 = vmov 6  }
  0x19   : > { %v402_v3 = vld [vmem:[%s377_s11 + $0x18] sm:$0xff]  ;;  %v401_v4 = vld [vmem:[%s377_s11 + $0x10] sm:$0xff]  ;;  %v474_v5 = vld [vmem:[%s384_s19] sm:$0xff]  ;;  %v1516_v50 = vmov 7   ;;  %s390_s13 = scalar_lea.vmem %s1885_s2, %s1624_s21  ;;  %s1202_s21 = sshll.u32 %s367_s14, 3  ;;  %vm624_vm6 = vcmask 122880  }
  0x1a   : > { %452 = vmatpush.msra.mxu0 %v402_v3  ;;  %1210 = vmatpush.xpose.msk.msra.mxu1 %vm427_vm0, %v474_v5  ;;  %v400_v8 = vld [vmem:[%s377_s11 + $0x8] sm:$0xff]  ;;  %v399_v10 = vld [vmem:[%s377_s11] sm:$0xff]  ;;  %v478_v18 = vld [vmem:[%s1888_s5 + $0x18] sm:$0xff]  ;;  %s1821_s16 = scalar_lea.vmem [#allocation3], %s1202_s21  ;;  %s1232_s19 = sshll.u32 %s1499_s30, 3 }
  0x1b   : > { %v398_v19 = vld [vmem:[%s1886_s3 + $0x18] sm:$0xff]  ;;  %v405_v21 = vld [vmem:[%s1887_s4 + $0x10] sm:$0xff]  ;;  %s1087_s22 = scalar_lea.hbm %s1891_s8, %s1232_s19  ;;  %s1089_s30 = sshll.u32 %s1821_s16, 4  ;;  %s1090_s30 = int_to_ptr.vmem [resolvable:$true] %s1089_s30 }
  0x1c   : > { %453 = vmatpush.msra.mxu0 %v401_v4  ;;  %v406_v20 = vld [vmem:[%s1887_s4 + $0x18] sm:$0xff]  ;;  %s1091_s23 = sshll.u32 %s1087_s22, 4  ;;  %s1075_s24 = scalar_lea.sflag [#allocation4], %s367_s14  ;;  %s1092_s23 = int_to_ptr.hbm [resolvable:$true] %s1091_s23 }
  0x1d   : > { %1211 = vmatmul.msk.f32.vlgmr.msra.gmra.mxu1 %vm427_vm0, %v475_v7  ;;  %424 = vperm.xlu2 %1301, %v406_v20   ;;  %s1443_s25 = sshra.s32 %s1092_s23, 4  ;;  %s1449_s21 = scalar_lea.hbm %s1891_s8, 16  ;;  %s1444_s25 = int_to_ptr.hbm [resolvable:$true] %s1443_s25 }
  0x1e   : > { %454 = vmatpush.msra.mxu0 %v400_v8  ;;  %s1445_s26 = scalar_lea.hbm %s1444_s25, 8  ;;  %p1450_p1 = scmp.lt.s32.totalorder %s1444_s25, %s1891_s8 }
  0x1f   : > { %485 = vperm.xlu1 %1300, %v479_v6   ;;  %p1446_p12 = scmp.ne.s32.totalorder %s1444_s25, %s1445_s26  ;;  %p1451_p2 = scmp.lt.s32.totalorder %s1449_s21, %s1445_s26 }
  0x20   : > { %495 = vperm.xlu0 %1299, %v481_v9   ;;  %455 = vmatpush.msra.mxu0 %v399_v10 }
  0x21   : > { %1206 = vmatmul.msk.f32.vlgmr.msra.gmra.mxu0 %vm427_vm0, %v395_v11  ;;  %p1447_p13 = pnand %p1446_p12, %p1602_p4  ;;  %p1452_p3 = por %p1451_p2, %p1450_p1 }
  0x23   : > { %p1448_p0 = pneg %p1447_p13 }
  0x25   : > { %1212 = vmatmul.msk.f32.gmra.mxu1 %vm427_vm0, %v476_v13  ;;  %419 = vperm.xlu2 %1301, %v405_v21   ;;  %p1453_p5 = pnand %p1452_p3, %p1448_p0 }
  0x27   : > { %409 = vperm.xlu1 %1300, %v403_v12  }
  0x28   : > { %414 = vperm.xlu0 %1299, %v404_v14  }
  0x29   : > { %1207 = vmatmul.msk.f32.gmra.mxu0 %vm427_vm0, %v396_v15 }
  0x2d   : > { %1213 = vmatmul.msk.f32.gmra.mxu1 %vm427_vm0, %v477_v16  ;;  %1304 = vset.pattern.permute.xlu2 %v1510_v22 }
  0x2f   : > { %1302 = vset.pattern.permute.xlu1 %v1511_v23 }
  0x31   : > { %1208 = vmatmul.msk.f32.gmra.mxu0 %vm427_vm0, %v397_v17 }
  0x35   : > { %1214 = vmatmul.msk.f32.gmra.mxu1 %vm427_vm0, %v478_v18 }
  0x39   : > { %1209 = vmatmul.msk.f32.gmra.mxu0 %vm427_vm0, %v398_v19 }
  0x77   : > { %v425_v46 = vpop.permute.xlu2 %424 }
  0x7f   : > { %v420_v47 = vpop.permute.xlu2 %419 }
  0x89   : > { %v491_v24 = vpop.permute.xlu1 %490 }
  0x8a   : > { %v501_v25 = vpop.permute.xlu0 %500 }
  0x91   : > { %v486_v26 = vpop.permute.xlu1 %485 }
  0x92   : > { %v496_v29 = vpop.permute.xlu0 %495 }
  0x99   : > { %v410_v30 = vpop.permute.xlu1 %409 }
  0x9a   : > { %v536_v27 = vpop.f32.mrf.mxu1  ;;  %v415_v35 = vpop.permute.xlu0 %414 }
  0x9b   : > { %v1690_v28 = vadd.f32 %v536_v27, %v486_v26 }
  0x9d   : > { %755 = vperm.xlu2 %1304, %v1690_v28   ;;  %627 = vperm.xlu1 %1302, %v1690_v28  }
  0x9e   : > { %v457_v31 = vpop.f32.mrf.mxu0  ;;  %556 = vperm.xlu0 %1299, %v1690_v28  }
  0x9f   : > { %v458_v32 = vadd.f32 %v457_v31, %v410_v30 }
  0xa1   : > { %470 = vst.msk [vmem:[#allocation2] sm:$0xff] %vm469_vm1, %v458_v32 }
  0xa2   : > { %v539_v33 = vpop.f32.mrf.mxu1 }
  0xa3   : > { %v1696_v34 = vadd.f32 %v539_v33, %v491_v24 }
  0xa5   : > { %1306 = vset.pattern.permute.xlu2 %v1512_v36  ;;  %1303 = vset.pattern.permute.xlu1 %v1513_v37 }
  0xa6   : > { %v460_v38 = vpop.f32.mrf.mxu0  ;;  %1312 = vset.pattern.permute.xlu0 %v1512_v36  ;;  %883 = vperm.xlu2 %1306, %v1690_v28  }
  0xa7   : > { %v461_v39 = vadd.f32 %v460_v38, %v415_v35  ;;  %691 = vperm.xlu1 %1303, %v1690_v28   ;;  %887 = vperm.xlu0 %1312, %v1696_v34  }
  0xa8   : > { %v1749_v13 = vld [vmem:[#allocation2] sm:$0xff] }
  0xa9   : > { %471 = vst.msk [vmem:[#allocation2 + $0x8] sm:$0xff] %vm469_vm1, %v461_v39 }
  0xaa   : > { %v542_v40 = vpop.f32.mrf.mxu1 }
  0xab   : > { %v543_v41 = vadd.f32 %v542_v40, %v496_v29 }
  0xae   : > { %1308 = vset.pattern.permute.xlu2 %v1511_v23  ;;  %v463_v48 = vpop.f32.mrf.mxu0 }
  0xaf   : > { %1305 = vset.pattern.permute.xlu1 %v1514_v42  ;;  %1316 = vset.pattern.permute.xlu0 %v1510_v22  ;;  %v464_v49 = vadd.f32 %v463_v48, %v420_v47 }
  0xb0   : > { %631 = vperm.xlu2 %1308, %v1696_v34   ;;  %819 = vperm.xlu1 %1305, %v1690_v28   ;;  %v1746_v10 = vld [vmem:[#allocation2 + $0x8] sm:$0xff] }
  0xb1   : > { %763 = vperm.xlu0 %1316, %v543_v41   ;;  %472 = vst.msk [vmem:[#allocation2 + $0x10] sm:$0xff] %vm469_vm1, %v464_v49 }
  0xb2   : > { %v545_v44 = vpop.f32.mrf.mxu1 }
  0xb3   : > { %v546_v45 = vadd.f32 %v545_v44, %v501_v25 }
  0xb6   : > { %v466_v51 = vpop.f32.mrf.mxu0 }
  0xb7   : > { %v467_v52 = vadd.f32 %v466_v51, %v425_v46 }
  0xb8   : > { %1310 = vset.pattern.permute.xlu2 %v1510_v22  ;;  %1307 = vset.pattern.permute.xlu1 %v1509_v1  ;;  %v1740_v5 = vld [vmem:[#allocation2 + $0x10] sm:$0xff] }
  0xb9   : > { %1319 = vset.pattern.permute.xlu0 %v1515_v43  ;;  %759 = vperm.xlu2 %1310, %v1696_v34   ;;  %473 = vst.msk [vmem:[#allocation2 + $0x18] sm:$0xff] %vm469_vm1, %v467_v52 }
  0xba   : > { %561 = vperm.xlu1 %1307, %v1696_v34   ;;  %955 = vperm.xlu0 %1319, %v543_v41  }
  0xc0   : > { %v1742_v7 = vld [vmem:[#allocation2 + $0x18] sm:$0xff] }
  0xc1   : > { %1311 = vset.pattern.permute.xlu2 %v1514_v42 }
  0xc2   : > { %1309 = vset.pattern.permute.xlu1 %v1513_v37  ;;  %1322 = vset.pattern.permute.xlu0 %v1511_v23 }
  0xc3   : > { %823 = vperm.xlu2 %1311, %v1696_v34   ;;  %695 = vperm.xlu1 %1309, %v1696_v34  }
  0xc4   : > { %639 = vperm.xlu0 %1322, %v546_v45  }
  0xcb   : > { %1314 = vset.pattern.permute.xlu2 %v1511_v23  ;;  %1313 = vset.pattern.permute.xlu1 %v1509_v1 }
  0xcc   : > { %1326 = vset.pattern.permute.xlu0 %v1514_v42  ;;  %635 = vperm.xlu2 %1314, %v543_v41  }
  0xcd   : > { %566 = vperm.xlu1 %1313, %v543_v41   ;;  %831 = vperm.xlu0 %1326, %v546_v45  }
  0xd4   : > { %1315 = vset.pattern.permute.xlu2 %v1513_v37 }
  0xd5   : > { %1318 = vset.pattern.permute.xlu1 %v1512_v36  ;;  %1332 = vset.pattern.permute.xlu0 %v1516_v50 }
  0xd6   : > { %699 = vperm.xlu2 %1315, %v543_v41   ;;  %891 = vperm.xlu1 %1318, %v543_v41  }
  0xd7   : > { %1011 = vperm.xlu0 %1332, %v1690_v28  }
  0xde   : > { %1317 = vset.pattern.permute.xlu2 %v1514_v42  ;;  %1320 = vset.pattern.permute.xlu1 %v1516_v50 }
  0xdf   : > { %827 = vperm.xlu2 %1317, %v543_v41   ;;  %1019 = vperm.xlu1 %1320, %v543_v41  }
  0xe7   : > { %1321 = vset.pattern.permute.xlu2 %v1509_v1  ;;  %1325 = vset.pattern.permute.xlu1 %v1510_v22  ;;  %v1757_v22 = vld [vmem:[%s1890_s7] sm:$0x1] }
  0xe8   : > { %571 = vperm.xlu2 %1321, %v546_v45   ;;  %767 = vperm.xlu1 %1325, %v546_v45  }
  0xf0   : > { %1323 = vset.pattern.permute.xlu2 %v1513_v37  ;;  %1327 = vset.pattern.permute.xlu1 %v1512_v36 }
  0xf1   : > { %703 = vperm.xlu2 %1323, %v546_v45   ;;  %895 = vperm.xlu1 %1327, %v546_v45  }
  0xf7   : > { %v1721_v53 = vpop.permute.xlu2 %755 }
  0xf9   : > { %1324 = vset.pattern.permute.xlu2 %v1515_v43  ;;  %1328 = vset.pattern.permute.xlu1 %v1515_v43 }
  0xfa   : > { %951 = vperm.xlu2 %1324, %v1696_v34   ;;  %959 = vperm.xlu1 %1328, %v546_v45  }
 0x100   : > { %v1724_v54 = vpop.permute.xlu2 %883 }
 0x102   : > { %1329 = vset.pattern.permute.xlu2 %v1516_v50  ;;  %1330 = vset.pattern.permute.xlu1 %v1516_v50 }
 0x103   : > { %1023 = vperm.xlu2 %1329, %v546_v45   ;;  %1015 = vperm.xlu1 %1330, %v1696_v34  }
 0x10a   : > { %v632_v55 = vpop.permute.xlu2 %631 }
 0x10b   : > { %1331 = vset.pattern.permute.xlu2 %v1515_v43  ;;  %v643_v11 = vadd.f32 %v632_v55, %v1746_v10 }
 0x10c   : > { %947 = vperm.xlu2 %1331, %v1690_v28  }
 0x10f   : > { %v628_v56 = vpop.permute.xlu1 %627 }
 0x110   : > { %v557_v57 = vpop.permute.xlu0 %556  ;;  %v642_v14 = vadd.f32 %v628_v56, %v1749_v13  ;;  %v770_v56 = vadd.f32 %v1721_v53, %v1749_v13 }
 0x111   : > { %v574_v25 = vadd.f32 %v557_v57, %v1749_v13 }
 0x113   : > { %v1728_v58 = vpop.permute.xlu2 %759 }
 0x114   : > { %v771_v52 = vadd.f32 %v1728_v58, %v1746_v10 }
 0x119   : > { %v692_v59 = vpop.permute.xlu1 %691  ;;  %v1730_v60 = vpop.permute.xlu0 %887 }
 0x11a   : > { %v706_v35 = vadd.f32 %v692_v59, %v1749_v13  ;;  %v899_v53 = vadd.f32 %v1730_v60, %v1746_v10 }
 0x11d   : > { %v1732_v61 = vpop.permute.xlu2 %823 }
 0x11e   : > { %v835_v41 = vadd.f32 %v1732_v61, %v1746_v10 }
 0x122   : > { %v1734_v62 = vpop.permute.xlu1 %819 }
 0x123   : > { %v1736_v63 = vpop.permute.xlu0 %763  ;;  %v834_v43 = vadd.f32 %v1734_v62, %v1749_v13 }
 0x124   : > { %v772_v49 = vadd.f32 %v1736_v63, %v1740_v5 }
 0x126   : > { %v636_v0 = vpop.permute.xlu2 %635 }
 0x127   : > { %v644_v8 = vadd.f32 %v636_v0, %v1740_v5 }
 0x12c   : > { %v562_v1 = vpop.permute.xlu1 %561  ;;  %v1738_v2 = vpop.permute.xlu0 %955 }
 0x12d   : > { %v575_v24 = vadd.f32 %v562_v1, %v1746_v10 }
 0x130   : > { %v700_v3 = vpop.permute.xlu2 %699 }
 0x131   : > { %v708_v29 = vadd.f32 %v700_v3, %v1740_v5  ;;  %v898_v3 = vadd.f32 %v1724_v54, %v1749_v13 }
 0x135   : > { %v696_v4 = vpop.permute.xlu1 %695 }
 0x136   : > { %v640_v6 = vpop.permute.xlu0 %639  ;;  %v707_v32 = vadd.f32 %v696_v4, %v1746_v10 }
 0x137   : > { %v645_v9 = vadd.f32 %v640_v6, %v1742_v7 }
 0x139   : > { %1333 = vtanh.f32 %v645_v9  ;;  %v828_v12 = vpop.permute.xlu2 %827 }
 0x13a   : > { %1335 = vtanh.f32 %v644_v8  ;;  %v836_v39 = vadd.f32 %v828_v12, %v1740_v5 }
 0x13b   : > { %1337 = vtanh.f32 %v643_v11  ;;  %v964_v11 = vadd.f32 %v1738_v2, %v1740_v5 }
 0x13c   : > { %1339 = vtanh.f32 %v642_v14 }
 0x13f   : > { %v1334_v15 = vpop.eup %1333  ;;  %v567_v16 = vpop.permute.xlu1 %566 }
 0x140   : > { %662 = vmatpush.msra.mxu3 %v1334_v15  ;;  %v1336_v17 = vpop.eup %1335  ;;  %v576_v20 = vadd.f32 %v567_v16, %v1740_v5  ;;  %v832_v33 = vpop.permute.xlu0 %831 }
 0x141   : > { %v1338_v19 = vpop.eup %1337  ;;  %v837_v37 = vadd.f32 %v832_v33, %v1742_v7 }
 0x142   : > { %v572_v18 = vpop.permute.xlu2 %571  ;;  %663 = vmatpush.msra.mxu3 %v1336_v17  ;;  %v1340_v23 = vpop.eup %1339 }
 0x143   : > { %v577_v21 = vadd.f32 %v572_v18, %v1742_v7 }
 0x144   : > { %664 = vmatpush.msra.mxu3 %v1338_v19 }
 0x145   : > { %1341 = vtanh.f32 %v577_v21 }
 0x146   : > { %665 = vmatpush.msra.mxu3 %v1340_v23  ;;  %1343 = vtanh.f32 %v576_v20 }
 0x147   : > { %1217 = vmatmul.msk.f32.vlgmr.msra.gmra.mxu3 %vm427_vm0, %v1757_v22  ;;  %1345 = vtanh.f32 %v575_v24 }
 0x148   : > { %v892_v26 = vpop.permute.xlu1 %891  ;;  %1347 = vtanh.f32 %v574_v25 }
 0x149   : > { %v900_v62 = vadd.f32 %v892_v26, %v1740_v5  ;;  %v1012_v19 = vpop.permute.xlu0 %1011 }
 0x14a   : > { %v1026_v21 = vadd.f32 %v1012_v19, %v1749_v13 }
 0x14b   : > { %v1342_v27 = vpop.eup %1341  ;;  %v704_v28 = vpop.permute.xlu2 %703 }
 0x14c   : > { %v709_v30 = vadd.f32 %v704_v28, %v1742_v7  ;;  %597 = vmatpush.msra.mxu2 %v1342_v27  ;;  %v1344_v31 = vpop.eup %1343 }
 0x14d   : > { %v1346_v34 = vpop.eup %1345 }
 0x14e   : > { %1349 = vtanh.f32 %v709_v30  ;;  %598 = vmatpush.msra.mxu2 %v1344_v31  ;;  %v1348_v36 = vpop.eup %1347 }
 0x14f   : > { %1351 = vtanh.f32 %v708_v29 }
 0x150   : > { %599 = vmatpush.msra.mxu2 %v1346_v34  ;;  %1353 = vtanh.f32 %v707_v32 }
 0x151   : > { %v1020_v38 = vpop.permute.xlu1 %1019  ;;  %1355 = vtanh.f32 %v706_v35 }
 0x152   : > { %600 = vmatpush.msra.mxu2 %v1348_v36  ;;  %1357 = vtanh.f32 %v837_v37  ;;  %v1028_v60 = vadd.f32 %v1020_v38, %v1740_v5 }
 0x153   : > { %1215 = vmatmul.msk.f32.vlgmr.msra.gmra.mxu2 %vm427_vm0, %v1757_v22  ;;  %1359 = vtanh.f32 %v836_v39 }
 0x154   : > { %v1350_v40 = vpop.eup %1349  ;;  %1361 = vtanh.f32 %v835_v41  ;;  %v952_v46 = vpop.permute.xlu2 %951 }
 0x155   : > { %726 = vmatpush.msrb.mxu2 %v1350_v40  ;;  %v1352_v42 = vpop.eup %1351  ;;  %1363 = vtanh.f32 %v834_v43  ;;  %v963_v15 = vadd.f32 %v952_v46, %v1746_v10 }
 0x156   : > { %v1354_v44 = vpop.eup %1353 }
 0x157   : > { %727 = vmatpush.msrb.mxu2 %v1352_v42  ;;  %v1356_v45 = vpop.eup %1355 }
 0x158   : > { %v1358_v48 = vpop.eup %1357 }
 0x159   : > { %728 = vmatpush.msrb.mxu2 %v1354_v44  ;;  %v1360_v51 = vpop.eup %1359 }
 0x15a   : > { %v768_v47 = vpop.permute.xlu1 %767  ;;  %v1362_v55 = vpop.eup %1361 }
 0x15b   : > { %v773_v50 = vadd.f32 %v768_v47, %v1742_v7  ;;  %729 = vmatpush.msrb.mxu2 %v1356_v45  ;;  %v1364_v57 = vpop.eup %1363 }
 0x15c   : > { %1219 = vmatmul.msk.f32.vlgmr.msrb.gmra.mxu2 %vm427_vm0, %v1757_v22 }
 0x15d   : > { %854 = vmatpush.msra.mxu2 %v1358_v48  ;;  %1365 = vtanh.f32 %v773_v50  ;;  %v1024_v58 = vpop.permute.xlu2 %1023 }
 0x15e   : > { %1367 = vtanh.f32 %v772_v49  ;;  %v1029_v6 = vadd.f32 %v1024_v58, %v1742_v7 }
 0x15f   : > { %855 = vmatpush.msra.mxu2 %v1360_v51  ;;  %1369 = vtanh.f32 %v771_v52 }
 0x160   : > { %1371 = vtanh.f32 %v770_v56 }
 0x161   : > { %856 = vmatpush.msra.mxu2 %v1362_v55 }
 0x163   : > { %857 = vmatpush.msra.mxu2 %v1364_v57  ;;  %v1366_v59 = vpop.eup %1365  ;;  %v896_v61 = vpop.permute.xlu1 %895 }
 0x164   : > { %v901_v63 = vadd.f32 %v896_v61, %v1742_v7  ;;  %790 = vmatpush.msrb.mxu3 %v1366_v59  ;;  %v1368_v0 = vpop.eup %1367  ;;  %1223 = vmatmul.msk.f32.vlgmr.msra.gmra.mxu2 %vm427_vm0, %v1757_v22 }
 0x165   : > { %v1370_v1 = vpop.eup %1369 }
 0x166   : > { %1373 = vtanh.f32 %v901_v63  ;;  %791 = vmatpush.msrb.mxu3 %v1368_v0  ;;  %v1372_v4 = vpop.eup %1371  ;;  %v948_v14 = vpop.permute.xlu2 %947 }
 0x167   : > { %1375 = vtanh.f32 %v900_v62  ;;  %v962_v17 = vadd.f32 %v948_v14, %v1749_v13 }
 0x168   : > { %792 = vmatpush.msrb.mxu3 %v1370_v1  ;;  %1377 = vtanh.f32 %v899_v53 }
 0x169   : > { %1379 = vtanh.f32 %v898_v3 }
 0x16a   : > { %793 = vmatpush.msrb.mxu3 %v1372_v4  ;;  %1381 = vtanh.f32 %v1029_v6 }
 0x16b   : > { %1221 = vmatmul.msk.f32.vlgmr.msrb.gmra.mxu3 %vm427_vm0, %v1757_v22 }
 0x16c   : > { %v1374_v8 = vpop.eup %1373  ;;  %v960_v9 = vpop.permute.xlu1 %959 }
 0x16d   : > { %v965_v54 = vadd.f32 %v960_v9, %v1742_v7  ;;  %918 = vmatpush.msra.mxu3 %v1374_v8  ;;  %v1376_v12 = vpop.eup %1375 }
 0x16e   : > { %v1378_v16 = vpop.eup %1377 }
 0x16f   : > { %1383 = vtanh.f32 %v965_v54  ;;  %919 = vmatpush.msra.mxu3 %v1376_v12  ;;  %v1380_v18 = vpop.eup %1379 }
 0x170   : > { %1385 = vtanh.f32 %v1028_v60  ;;  %v1382_v2 = vpop.eup %1381 }
 0x171   : > { %1387 = vtanh.f32 %v964_v11  ;;  %920 = vmatpush.msra.mxu3 %v1378_v16 }
 0x172   : > { %1389 = vtanh.f32 %v963_v15 }
 0x173   : > { %921 = vmatpush.msra.mxu3 %v1380_v18  ;;  %1391 = vtanh.f32 %v962_v17 }
 0x174   : > { %1225 = vmatmul.msk.f32.vlgmr.msra.gmra.mxu3 %vm427_vm0, %v1757_v22 }
 0x175   : > { %v1384_v5 = vpop.eup %1383  ;;  %1046 = vmatpush.msrb.mxu3 %v1382_v2  ;;  %v1016_v7 = vpop.permute.xlu1 %1015 }
 0x176   : > { %v1386_v20 = vpop.eup %1385  ;;  %v1027_v23 = vadd.f32 %v1016_v7, %v1746_v10  ;;  %982 = vmatpush.msrb.mxu2 %v1384_v5  ;;  %v1813_v10 = vld [vmem:[%s390_s13] sm:$0x1] }
 0x177   : > { %v1388_v24 = vpop.eup %1387  ;;  %1047 = vmatpush.msrb.mxu3 %v1386_v20 }
 0x178   : > { %1393 = vtanh.f32 %v1027_v23  ;;  %983 = vmatpush.msrb.mxu2 %v1388_v24  ;;  %v1390_v25 = vpop.eup %1389 }
 0x179   : > { %1395 = vtanh.f32 %v1026_v21  ;;  %v1392_v26 = vpop.eup %1391 }
 0x17a   : > { %984 = vmatpush.msrb.mxu2 %v1390_v25 }
 0x17c   : > { %985 = vmatpush.msrb.mxu2 %v1392_v26 }
 0x17d   : > { %1227 = vmatmul.msk.f32.vlgmr.msrb.gmra.mxu2 %vm427_vm0, %v1757_v22 }
 0x17e   : > { %v1394_v27 = vpop.eup %1393 }
 0x17f   : > { %1048 = vmatpush.msrb.mxu3 %v1394_v27  ;;  %v1396_v28 = vpop.eup %1395 }
 0x181   : > { %1049 = vmatpush.msrb.mxu3 %v1396_v28 }
 0x182   : > { %1229 = vmatmul.msk.f32.vlgmr.msrb.gmra.mxu3 %vm427_vm0, %v1757_v22 }
 0x1ca   : > { %v667_v13 = vpop.f32.mrf.mxu3 }
 0x1cb   : > { %v668_v29 = vadd.f32 %v667_v13, %v1813_v10 }
 0x1cd   : > { %v1218_v30 = vmul.f32 -1.442695, %v668_v29 }
 0x1cf   : > { %1397 = vpow2.f32 %v1218_v30 }
 0x1d5   : > { %v1398_v31 = vpop.eup %1397 }
 0x1d6   : > { %v602_v32 = vpop.f32.mrf.mxu2  ;;  %v673_v33 = vadd.f32 1.0, %v1398_v31 }
 0x1d7   : > { %v603_v34 = vadd.f32 %v602_v32, %v1813_v10 }
 0x1d8   : > { %1399 = vrcp.f32 %v673_v33  ;;  %vm679_vm2 = vweird.f32 %v673_v33  ;;  %v685_v37 = vand.u32 2147483648, %v673_v33  ;;  %v683_v41 = vand.u32 2147483647, %v673_v33 }
 0x1d9   : > { %v1216_v22 = vmul.f32 -1.442695, %v603_v34 }
 0x1da   : > { %v686_v46 = vor.u32 1.1754944e-38, %v685_v37  ;;  %vm684_vm5 = vcmp.eq.f32.partialorder %v683_v41, 8.507059e+37 }
 0x1db   : > { %1401 = vpow2.f32 %v1216_v22 }
 0x1de   : > { %v1400_v35 = vpop.eup %1399 }
 0x1df   : > { %v675_v36 = vmul.f32 %v1400_v35, %v673_v33  ;;  %v731_v38 = vpop.f32.mrf.mxu2  ;;  %vm680_vm3 = vweird.f32 %v1400_v35 }
 0x1e0   : > { %v732_v42 = vadd.f32 %v731_v38, %v1813_v10  ;;  %vm681_vm4 = vmor %vm679_vm2, %vm680_vm3 }
 0x1e1   : > { %v1402_v39 = vpop.eup %1401  ;;  %v676_v40 = vsub.f32 1.0, %v675_v36 }
 0x1e2   : > { %v608_v43 = vadd.f32 1.0, %v1402_v39  ;;  %v1220_v45 = vmul.f32 -1.442695, %v732_v42 }
 0x1e3   : > { %v677_v44 = vmul.f32 %v1400_v35, %v676_v40 }
 0x1e4   : > { %1403 = vrcp.f32 %v608_v43  ;;  %vm614_vm7 = vweird.f32 %v608_v43  ;;  %v620_v59 = vand.u32 2147483648, %v608_v43  ;;  %v618_v58 = vand.u32 2147483647, %v608_v43 }
 0x1e5   : > { %v678_v47 = vadd.f32 %v1400_v35, %v677_v44  ;;  %1405 = vpow2.f32 %v1220_v45 }
 0x1e6   : > { %v621_v1 = vor.u32 1.1754944e-38, %v620_v59  ;;  %vm619_vm10 = vcmp.eq.f32.partialorder %v618_v58, 8.507059e+37 }
 0x1e7   : > { %v682_v48 = vsel %vm681_vm4, %v1400_v35, %v678_v47  ;;  %v859_v50 = vpop.f32.mrf.mxu2 }
 0x1e8   : > { %v687_v49 = vsel %vm684_vm5, %v686_v46, %v682_v48  ;;  %v860_v51 = vadd.f32 %v859_v50, %v1813_v10 }
 0x1e9   : > { %689 = vst.msk [vmem:[%s1821_s16 + $0x1] sm:$0x1] %vm624_vm6, %v687_v49 }
 0x1ea   : > { %v1404_v52 = vpop.eup %1403  ;;  %v1224_v57 = vmul.f32 -1.442695, %v860_v51 }
 0x1eb   : > { %v1406_v55 = vpop.eup %1405  ;;  %v610_v56 = vmul.f32 %v1404_v52, %v608_v43  ;;  %vm615_vm8 = vweird.f32 %v1404_v52 }
 0x1ec   : > { %v737_v61 = vadd.f32 1.0, %v1406_v55  ;;  %1407 = vpow2.f32 %v1224_v57  ;;  %vm616_vm9 = vmor %vm614_vm7, %vm615_vm8 }
 0x1ed   : > { %v611_v62 = vsub.f32 1.0, %v610_v56 }
 0x1ee   : > { %1409 = vrcp.f32 %v737_v61  ;;  %v795_v63 = vpop.f32.mrf.mxu3  ;;  %v749_v12 = vand.u32 2147483648, %v737_v61  ;;  %vm743_vm11 = vweird.f32 %v737_v61  ;;  %v747_v15 = vand.u32 2147483647, %v737_v61 }
 0x1ef   : > { %v612_v0 = vmul.f32 %v1404_v52, %v611_v62  ;;  %v796_v53 = vadd.f32 %v795_v63, %v1813_v10 }
 0x1f0   : > { %v750_v2 = vor.u32 1.1754944e-38, %v749_v12  ;;  %vm748_vm14 = vcmp.eq.f32.partialorder %v747_v15, 8.507059e+37 }
 0x1f1   : > { %v613_v3 = vadd.f32 %v1404_v52, %v612_v0  ;;  %v1222_v4 = vmul.f32 -1.442695, %v796_v53 }
 0x1f2   : > { %v1408_v6 = vpop.eup %1407 }
 0x1f3   : > { %v617_v8 = vsel %vm616_vm9, %v1404_v52, %v613_v3  ;;  %1411 = vpow2.f32 %v1222_v4  ;;  %v865_v11 = vadd.f32 1.0, %v1408_v6 }
 0x1f4   : > { %v1410_v60 = vpop.eup %1409  ;;  %v622_v9 = vsel %vm619_vm10, %v621_v1, %v617_v8 }
 0x1f5   : > { %625 = vst.msk [vmem:[%s1821_s16] sm:$0x1] %vm624_vm6, %v622_v9  ;;  %v739_v54 = vmul.f32 %v1410_v60, %v737_v61  ;;  %1413 = vrcp.f32 %v865_v11  ;;  %vm744_vm12 = vweird.f32 %v1410_v60  ;;  %v877_v26 = vand.u32 2147483648, %v865_v11 }
 0x1f6   : > { %vm745_vm13 = vmor %vm743_vm11, %vm744_vm12  ;;  %vm871_vm15 = vweird.f32 %v865_v11  ;;  %v875_v28 = vand.u32 2147483647, %v865_v11 }
 0x1f7   : > { %v740_v14 = vsub.f32 1.0, %v739_v54  ;;  %v923_v16 = vpop.f32.mrf.mxu3  ;;  %v878_v32 = vor.u32 1.1754944e-38, %v877_v26 }
 0x1f8   : > { %v924_v17 = vadd.f32 %v923_v16, %v1813_v10  ;;  %vm876_vm2 = vcmp.eq.f32.partialorder %v875_v28, 8.507059e+37 }
 0x1f9   : > { %v1412_v18 = vpop.eup %1411  ;;  %v741_v19 = vmul.f32 %v1410_v60, %v740_v14 }
 0x1fa   : > { %v801_v5 = vadd.f32 1.0, %v1412_v18  ;;  %v1226_v7 = vmul.f32 -1.442695, %v924_v17 }
 0x1fb   : > { %v742_v20 = vadd.f32 %v1410_v60, %v741_v19  ;;  %v1414_v21 = vpop.eup %1413 }
 0x1fc   : > { %1415 = vrcp.f32 %v801_v5  ;;  %v867_v24 = vmul.f32 %v1414_v21, %v865_v11  ;;  %vm872_vm0 = vweird.f32 %v1414_v21  ;;  %vm807_vm3 = vweird.f32 %v801_v5 }
 0x1fd   : > { %v746_v23 = vsel %vm745_vm13, %v1410_v60, %v742_v20  ;;  %1417 = vpow2.f32 %v1226_v7  ;;  %vm873_vm1 = vmor %vm871_vm15, %vm872_vm0  ;;  %v813_v40 = vand.u32 2147483648, %v801_v5  ;;  %v811_v43 = vand.u32 2147483647, %v801_v5 }
 0x1fe   : > { %v751_v25 = vsel %vm748_vm14, %v750_v2, %v746_v23  ;;  %v868_v27 = vsub.f32 1.0, %v867_v24 }
 0x1ff   : > { %753 = vst.msk [vmem:[%s1821_s16 + $0x2] sm:$0x1] %vm624_vm6, %v751_v25  ;;  %v814_v47 = vor.u32 1.1754944e-38, %v813_v40  ;;  %vm812_vm7 = vcmp.eq.f32.partialorder %v811_v43, 8.507059e+37 }
 0x200   : > { %v987_v13 = vpop.f32.mrf.mxu2  ;;  %v869_v29 = vmul.f32 %v1414_v21, %v868_v27 }
 0x201   : > { %v988_v30 = vadd.f32 %v987_v13, %v1813_v10 }
 0x202   : > { %v1416_v31 = vpop.eup %1415  ;;  %v870_v22 = vadd.f32 %v1414_v21, %v869_v29 }
 0x203   : > { %v1418_v33 = vpop.eup %1417  ;;  %v803_v34 = vmul.f32 %v1416_v31, %v801_v5  ;;  %v1228_v35 = vmul.f32 -1.442695, %v988_v30  ;;  %vm808_vm4 = vweird.f32 %v1416_v31 }
 0x204   : > { %v929_v36 = vadd.f32 1.0, %v1418_v33  ;;  %v874_v38 = vsel %vm873_vm1, %v1414_v21, %v870_v22  ;;  %vm809_vm5 = vmor %vm807_vm3, %vm808_vm4 }
 0x205   : > { %v804_v37 = vsub.f32 1.0, %v803_v34  ;;  %1419 = vpow2.f32 %v1228_v35  ;;  %v1051_v39 = vpop.f32.mrf.mxu3  ;;  %v879_v41 = vsel %vm876_vm2, %v878_v32, %v874_v38 }
 0x206   : > { %1421 = vrcp.f32 %v929_v36  ;;  %881 = vst.msk [vmem:[%s1821_s16 + $0x4] sm:$0x1] %vm624_vm6, %v879_v41  ;;  %v1052_v44 = vadd.f32 %v1051_v39, %v1813_v10  ;;  %v941_v57 = vand.u32 2147483648, %v929_v36  ;;  %vm935_vm8 = vweird.f32 %v929_v36 }
 0x207   : > { %v805_v42 = vmul.f32 %v1416_v31, %v804_v37  ;;  %v939_v61 = vand.u32 2147483647, %v929_v36 }
 0x208   : > { %v1230_v46 = vmul.f32 -1.442695, %v1052_v44  ;;  %v942_v0 = vor.u32 1.1754944e-38, %v941_v57 }
 0x209   : > { %v806_v45 = vadd.f32 %v1416_v31, %v805_v42  ;;  %vm940_vm11 = vcmp.eq.f32.partialorder %v939_v61, 8.507059e+37 }
 0x20a   : > { %1423 = vpow2.f32 %v1230_v46 }
 0x20b   : > { %v1420_v48 = vpop.eup %1419  ;;  %v810_v49 = vsel %vm809_vm5, %v1416_v31, %v806_v45 }
 0x20c   : > { %v1422_v50 = vpop.eup %1421  ;;  %v815_v51 = vsel %vm812_vm7, %v814_v47, %v810_v49  ;;  %v993_v52 = vadd.f32 1.0, %v1420_v48 }
 0x20d   : > { %817 = vst.msk [vmem:[%s1821_s16 + $0x3] sm:$0x1] %vm624_vm6, %v815_v51  ;;  %v931_v55 = vmul.f32 %v1422_v50, %v929_v36  ;;  %vm936_vm9 = vweird.f32 %v1422_v50 }
 0x20e   : > { %1425 = vrcp.f32 %v993_v52  ;;  %vm937_vm10 = vmor %vm935_vm8, %vm936_vm9  ;;  %v1005_v6 = vand.u32 2147483648, %v993_v52  ;;  %v1003_v60 = vand.u32 2147483647, %v993_v52  ;;  %vm999_vm13 = vweird.f32 %v993_v52 }
 0x20f   : > { %v932_v56 = vsub.f32 1.0, %v931_v55 }
 0x210   : > { %v1424_v59 = vpop.eup %1423  ;;  %v1006_v12 = vor.u32 1.1754944e-38, %v1005_v6  ;;  %vm1004_vm15 = vcmp.eq.f32.partialorder %v1003_v60, 8.507059e+37 }
 0x211   : > { %v933_v10 = vmul.f32 %v1422_v50, %v932_v56  ;;  %v1057_v62 = vadd.f32 1.0, %v1424_v59 }
 0x213   : > { %v934_v58 = vadd.f32 %v1422_v50, %v933_v10  ;;  %1427 = vrcp.f32 %v1057_v62  ;;  %v1069_v17 = vand.u32 2147483648, %v1057_v62  ;;  %v1067_v19 = vand.u32 2147483647, %v1057_v62 }
 0x214   : > { %v1426_v63 = vpop.eup %1425  ;;  %vm1063_vm1 = vweird.f32 %v1057_v62 }
 0x215   : > { %v938_v53 = vsel %vm937_vm10, %v1422_v50, %v934_v58  ;;  %v995_v1 = vmul.f32 %v1426_v63, %v993_v52  ;;  %vm1000_vm12 = vweird.f32 %v1426_v63  ;;  %v1070_v5 = vor.u32 1.1754944e-38, %v1069_v17 }
 0x216   : > { %v943_v3 = vsel %vm940_vm11, %v942_v0, %v938_v53  ;;  %vm1001_vm14 = vmor %vm999_vm13, %vm1000_vm12  ;;  %vm1068_vm3 = vcmp.eq.f32.partialorder %v1067_v19, 8.507059e+37 }
 0x217   : > { %945 = vst.msk [vmem:[%s1821_s16 + $0x5] sm:$0x1] %vm624_vm6, %v943_v3  ;;  %v996_v4 = vsub.f32 1.0, %v995_v1 }
 0x219   : > { %v997_v8 = vmul.f32 %v1426_v63, %v996_v4  ;;  %v1428_v9 = vpop.eup %1427 }
 0x21a   : > { %v1059_v54 = vmul.f32 %v1428_v9, %v1057_v62  ;;  %vm1064_vm0 = vweird.f32 %v1428_v9 }
 0x21b   : > { %v998_v11 = vadd.f32 %v1426_v63, %v997_v8  ;;  %vm1065_vm2 = vmor %vm1063_vm1, %vm1064_vm0 }
 0x21c   : > { %v1060_v15 = vsub.f32 1.0, %v1059_v54 }
 0x21d   : > { %v1002_v14 = vsel %vm1001_vm14, %v1426_v63, %v998_v11 }
 0x21e   : > { %v1007_v16 = vsel %vm1004_vm15, %v1006_v12, %v1002_v14  ;;  %v1061_v18 = vmul.f32 %v1428_v9, %v1060_v15 }
 0x21f   : > { %1009 = vst.msk [vmem:[%s1821_s16 + $0x6] sm:$0x1] %vm624_vm6, %v1007_v16 }
 0x220   : > { %v1062_v2 = vadd.f32 %v1428_v9, %v1061_v18 }
 0x222   : > { %v1066_v7 = vsel %vm1065_vm2, %v1428_v9, %v1062_v2 }
 0x223   : > { %v1071_v20 = vsel %vm1068_vm3, %v1070_v5, %v1066_v7 }
 0x224   : > { %1073 = vst.msk [vmem:[%s1821_s16 + $0x7] sm:$0x1] %vm624_vm6, %v1071_v20 }
 0x225   : > { %1456 = shalt.err (!%p1453_p5)
}
 0x226   : > { %1236 = dma.vmem_to_hbm [thread:$0]  (%p1602_p4), %s1090_s30, 128, %s1092_s23, %s1075_s24  }
 0x227 PF: > { %p1242_p6 = scmp.ge.s32.totalorder %s1507_s10, 2  ;;  %s1103_s14 = sand.u32 1, %s1487_s27  }
 0x228   : > { %s1104_s16 = scalar_lea.sflag [#allocation4], %s1103_s14 }
 0x229   : > { %p1239_p7 = pnand %p1242_p6, %p1609_p8 }
 0x22b   : > { %p1240_p9 = pneg %p1239_p7 }
 0x22d   : > { %1482 = dma.done.wait (%p1240_p9), %s1104_s16, 128  }
 0x22e   : > { %1484 = vsyncadd (%p1240_p9), %s1104_s16, 4294967168  ;;  %s21_s10 = sadd.s32 1, %s1507_s10   ;;  %s1896_s15 = sld [smem:[#allocation6_spill]] }
 0x22f   : > { %p18_p10 = scmp.ge.s32.totalorder %s21_s10, 4   ;;  %s1897_s27 = smov %s1491_s28 }
 0x230   : > { %s1898_s28 = smov %s1495_s29  ;;  %s1899_s29 = smov %s1615_s18 }
 0x231   : > { %s1900_s30 = smov %s1503_s9  ;;  %20 = sbr.rel (!%p18_p10) target bundleno = 4 (0x4), region = 97 }
 0x234   : > { %s1901_s9 = smov %s1896_s15 }
 0x236   :  { %1110 = vsyncpa [#allocation4], 1 }
 0x237   :  { %1112 = vsyncpa [#allocation4 + $0x1], 1 }

</bundles_post_ra>
